<compile_context>
chip_gen: v6e
topology: v6e:2x2x1
jax: 0.10.0
libtpu: 0.0.40
codegen_flags: <defaults>
</compile_context>

<pallas_src>
import functools

import jax
import jax.numpy as jnp
from jax import lax
from jax.experimental import pallas as pl
from jax.experimental.pallas import tpu as pltpu


def _round_up(x, m):
    return ((x + m - 1) // m) * m


def _cln_kernel(x_ref, gain_ref, bias_ref, o_ref, carry_ref,
                *, block_b, channels, block_t, eps):
    t = pl.program_id(1)

    # Reset running (per-batch-row) totals at the first T-block.
    @pl.when(t == 0)
    def _():
        carry_ref[...] = jnp.zeros_like(carry_ref)

    g = gain_ref[...]                                   # (C, 1)
    b = bias_ref[...]                                   # (C, 1)

    # entry_cnt = C * (global_t_index + 1), computed in f32 (no int overflow).
    pos = lax.broadcasted_iota(jnp.int32, (1, block_t), 1) + t * block_t + 1
    inv_cnt = 1.0 / (pos.astype(jnp.float32) * float(channels))   # (1, TT)
    # (pl.reciprocal(..., approx=True) would move this to the EUP, but exact
    #  division keeps the tight numerical match with the PyTorch reference.)

    scan_idx = lax.broadcasted_iota(jnp.int32, (2, block_t), 1)   # hoisted

    for r in range(block_b):                            # unrolled, static index
        x = x_ref[r]                                    # (C, TT)
        s = jnp.sum(x, axis=0, keepdims=True)           # (1, TT) sum over C
        q = jnp.sum(x * x, axis=0, keepdims=True)       # (1, TT) sum of squares
        sq = jnp.concatenate([s, q], axis=0)            # (2, TT) scan both at once

        # Hillis-Steele inclusive prefix sum along the lane axis:
        # log2(TT) steps of XLU roll + masked VPU add (no MXU, no tri matrix).
        k = 1
        while k < block_t:
            rolled = pltpu.roll(sq, k, axis=1)
            sq = sq + jnp.where(scan_idx >= k, rolled, 0.0)
            k *= 2

        cum = sq + carry_ref[r]                         # add totals of prev blocks
        carry_ref[r] = cum[:, block_t - 1:]             # new totals = last lane

        cum_s = cum[0:1]                                # (1, TT)
        cum_q = cum[1:2]                                # (1, TT)

        mean = cum_s * inv_cnt
        var = (cum_q - 2.0 * mean * cum_s) * inv_cnt + mean * mean
        inv_std = lax.rsqrt(var + eps)                  # EUP slot

        o_ref[r] = ((x - mean) * inv_std * g + b).astype(o_ref.dtype)


def cumulative_layer_norm_1d(x, gain, bias, *, eps=1e-5, block_t=None,
                             block_b=None):
    """x: (B, C, T); gain/bias: any shape with exactly C elements (e.g. (1,C,1))."""
    orig_dtype = x.dtype
    B, C, T = x.shape
    xf = x.astype(jnp.float32)

    gain2d = jnp.asarray(gain, jnp.float32)
    bias2d = jnp.asarray(bias, jnp.float32)
    assert gain2d.size == C and bias2d.size == C, \
        "gain/bias must contain exactly one value per channel"
    gain2d = gain2d.reshape(C, 1)
    bias2d = bias2d.reshape(C, 1)

    c_pad = _round_up(C, 8)                 # f32 sublane footprint of channel dim
    t_full = _round_up(T, 128)

    # --- tile sizing: keep double-buffered x + out blocks under ~8 MiB, which
    # fits even v5e's 16 MiB default scoped VMEM with headroom. ---------------
    budget = 8 * 1024 * 1024
    if block_t is None:
        tt_budget = budget // (2 * 2 * c_pad * 4)        # lanes per batch row
        block_t = max(128, min(2048, (tt_budget // 128) * 128))
    tt = min(_round_up(block_t, 128), t_full)
    t_pad = _round_up(T, tt)
    nt = t_pad // tt

    if block_b is None:
        # Fold batch rows per grid step to amortize the ~0.35us/step overhead,
        # but keep >=2 batch groups for megacore sharding when B allows.
        per_row = 2 * 2 * c_pad * tt * 4
        block_b = 1
        for cand in (8, 4, 2):
            if B % cand == 0 and B // cand >= 2 and cand * per_row <= budget:
                block_b = cand
                break
    b_pad = _round_up(B, block_b)
    nb = b_pad // block_b

    if (b_pad - B) or (t_pad - T):
        xf = jnp.pad(xf, ((0, b_pad - B), (0, 0), (0, t_pad - T)))

    kernel = functools.partial(_cln_kernel, block_b=block_b, channels=C,
                               block_t=tt, eps=float(eps))

    out = pl.pallas_call(
        kernel,
        out_shape=jax.ShapeDtypeStruct((b_pad, C, t_pad), orig_dtype),
        grid_spec=pltpu.PrefetchScalarGridSpec(
            num_scalar_prefetch=0,
            grid=(nb, nt),                               # scan axis (T) innermost
            in_specs=[
                pl.BlockSpec((block_b, C, tt), lambda bb, t: (bb, 0, t)),
                pl.BlockSpec((C, 1), lambda bb, t: (0, 0)),
                pl.BlockSpec((C, 1), lambda bb, t: (0, 0)),
            ],
            out_specs=pl.BlockSpec((block_b, C, tt), lambda bb, t: (bb, 0, t)),
            scratch_shapes=[pltpu.VMEM((block_b, 2, 1), jnp.float32)],  # carries
        ),
        compiler_params=pltpu.CompilerParams(
            dimension_semantics=("parallel", "arbitrary"),
            vmem_limit_bytes=48 * 1024 * 1024),
    )(xf, gain2d, bias2d)

    return out[:B, :, :T]


if __name__ == "__main__":
    B, C, T = 4, 4, 300
    eps = 1e-5

    key = jax.random.PRNGKey(0)
    kx, kg, kb = jax.random.split(key, 3)
    x = jax.random.normal(kx, (B, C, T), dtype=jnp.float32)
    gain = 1.0 + 0.1 * jax.random.normal(kg, (1, C, 1), dtype=jnp.float32)
    bias = 0.05 * jax.random.normal(kb, (1, C, 1), dtype=jnp.float32)

    # Small tiles so the demo exercises multi-row blocks (block_b=2), the
    # multi-T-block carry path (nt=3), and a >=2-wide parallel batch axis.
    out = cumulative_layer_norm_1d(x, gain, bias, eps=eps, block_t=128, block_b=2)
    out = jax.block_until_ready(out)

    # Pure-JAX reference of the PyTorch forward.
    cum_sum = jnp.cumsum(x.sum(axis=1), axis=1)                 # (B, T)
    cum_pow = jnp.cumsum((x * x).sum(axis=1), axis=1)           # (B, T)
    cnt = (C * jnp.arange(1, T + 1)).astype(jnp.float32)[None, :]
    cum_mean = cum_sum / cnt
    cum_var = (cum_pow - 2.0 * cum_mean * cum_sum) / cnt + cum_mean ** 2
    cum_std = jnp.sqrt(cum_var + eps)
    ref = (x - cum_mean[:, None, :]) / cum_std[:, None, :] * gain + bias

    assert out.shape == (B, C, T)
    err = float(jnp.max(jnp.abs(out - ref)))
    assert jnp.allclose(out, ref, atol=2e-4, rtol=2e-4), f"max abs err = {err}"
    print("KERNEL_OK")
</pallas_src>

<mosaic_0001>
module attributes {stable_mosaic.version = 11 : i64} {
  func.func @_cln_kernel(%arg0: i32, %arg1: i32, %arg2: memref<2x4x128xf32, #tpu.memory_space<vmem>>, %arg3: memref<4x1xf32, #tpu.memory_space<vmem>>, %arg4: memref<4x1xf32, #tpu.memory_space<vmem>>, %arg5: memref<2x4x128xf32, #tpu.memory_space<vmem>>, %arg6: memref<2x2x1xf32, #tpu.memory_space<vmem>>) attributes {dimension_semantics = [#tpu.dimension_semantics<parallel>, #tpu.dimension_semantics<arbitrary>], iteration_bounds = array<i64: 2, 3>, scalar_prefetch = 0 : i64, scratch_operands = 1 : i64, tpu.core_type = #tpu.core_type<tc>, window_params = [{transform_indices = @transform_0, window_bounds = array<i64: 2, 4, 128>}, {pipeline_mode = #tpu.pipeline_mode<synchronous>, transform_indices = @transform_1, window_bounds = array<i64: 4, 1>}, {pipeline_mode = #tpu.pipeline_mode<synchronous>, transform_indices = @transform_2, window_bounds = array<i64: 4, 1>}, {transform_indices = @transform_3, window_bounds = array<i64: 2, 4, 128>}]} {
    %c0_i32 = arith.constant 0 : i32
    %0 = arith.cmpi eq, %arg1, %c0_i32 : i32
    %1 = arith.extui %0 : i1 to i32
    %c0_i32_0 = arith.constant 0 : i32
    %2 = arith.cmpi ne, %1, %c0_i32_0 : i32
    scf.if %2 {
      %cst_72 = arith.constant 0.000000e+00 : f32
      %181 = vector.broadcast %cst_72 : f32 to vector<2x2x1xf32>
      %c0_73 = arith.constant 0 : index
      %c0_74 = arith.constant 0 : index
      %c0_75 = arith.constant 0 : index
      %182 = vector.load %arg6[%c0_73, %c0_74, %c0_75] : memref<2x2x1xf32, #tpu.memory_space<vmem>>, vector<2x2x1xf32>
      tpu.vector_store %arg6[%c0_73, %c0_74, %c0_75], %181 {strides = array<i32>} : memref<2x2x1xf32, #tpu.memory_space<vmem>>, vector<2x2x1xf32>,
    } else {
    }
    %c0 = arith.constant 0 : index
    %c0_1 = arith.constant 0 : index
    %3 = vector.load %arg3[%c0, %c0_1] : memref<4x1xf32, #tpu.memory_space<vmem>>, vector<4x1xf32>
    %c0_2 = arith.constant 0 : index
    %c0_3 = arith.constant 0 : index
    %4 = vector.load %arg4[%c0_2, %c0_3] : memref<4x1xf32, #tpu.memory_space<vmem>>, vector<4x1xf32>
    %5 = tpu.iota {dimensions = array<i32: 1>} : vector<1x128xi32>
    %c128_i32 = arith.constant 128 : i32
    %6 = arith.muli %arg1, %c128_i32 : i32
    %7 = vector.broadcast %6 : i32 to vector<1x128xi32>
    %8 = arith.addi %5, %7 : vector<1x128xi32>
    %c1_i32 = arith.constant 1 : i32
    %9 = vector.broadcast %c1_i32 : i32 to vector<1x128xi32>
    %10 = arith.addi %8, %9 : vector<1x128xi32>
    %11 = arith.sitofp %10 : vector<1x128xi32> to vector<1x128xf32>
    %cst = arith.constant 4.000000e+00 : f32
    %12 = vector.broadcast %cst : f32 to vector<1x128xf32>
    %13 = arith.mulf %11, %12 : vector<1x128xf32>
    %cst_4 = arith.constant 1.000000e+00 : f32
    %14 = vector.broadcast %cst_4 : f32 to vector<1x128xf32>
    %15 = arith.divf %14, %13 : vector<1x128xf32>
    %16 = tpu.iota {dimensions = array<i32: 1>} : vector<2x128xi32>
    %c0_5 = arith.constant 0 : index
    %c0_6 = arith.constant 0 : index
    %c0_7 = arith.constant 0 : index
    %17 = vector.load %arg2[%c0_5, %c0_6, %c0_7] : memref<2x4x128xf32, #tpu.memory_space<vmem>>, vector<1x4x128xf32>
    %18 = vector.shape_cast %17 : vector<1x4x128xf32> to vector<4x128xf32>
    %cst_8 = arith.constant dense<0.000000e+00> : vector<128xf32>
    %19 = vector.multi_reduction <add>, %18, %cst_8 [0] : vector<4x128xf32> to vector<128xf32>
    %20 = vector.shape_cast %19 : vector<128xf32> to vector<1x128xf32>
    %21 = arith.mulf %18, %18 : vector<4x128xf32>
    %cst_9 = arith.constant dense<0.000000e+00> : vector<128xf32>
    %22 = vector.multi_reduction <add>, %21, %cst_9 [0] : vector<4x128xf32> to vector<128xf32>
    %23 = vector.shape_cast %22 : vector<128xf32> to vector<1x128xf32>
    %24 = tpu.concatenate %20, %23 in 0 : vector<1x128xf32>, vector<1x128xf32> -> vector<2x128xf32>
    %c1_i32_10 = arith.constant 1 : i32
    %25 = tpu.dynamic_rotate %24 by %c1_i32_10 dim 1 : vector<2x128xf32>, i32 -> vector<2x128xf32>
    %c1_i32_11 = arith.constant 1 : i32
    %26 = vector.broadcast %c1_i32_11 : i32 to vector<2x128xi32>
    %27 = arith.cmpi sge, %16, %26 : vector<2x128xi32>
    %cst_12 = arith.constant 0.000000e+00 : f32
    %28 = vector.broadcast %cst_12 : f32 to vector<2x128xf32>
    %29 = arith.select %27, %25, %28 : vector<2x128xi1>, vector<2x128xf32>
    %30 = arith.addf %24, %29 : vector<2x128xf32>
    %c2_i32 = arith.constant 2 : i32
    %31 = tpu.dynamic_rotate %30 by %c2_i32 dim 1 : vector<2x128xf32>, i32 -> vector<2x128xf32>
    %c2_i32_13 = arith.constant 2 : i32
    %32 = vector.broadcast %c2_i32_13 : i32 to vector<2x128xi32>
    %33 = arith.cmpi sge, %16, %32 : vector<2x128xi32>
    %cst_14 = arith.constant 0.000000e+00 : f32
    %34 = vector.broadcast %cst_14 : f32 to vector<2x128xf32>
    %35 = arith.select %33, %31, %34 : vector<2x128xi1>, vector<2x128xf32>
    %36 = arith.addf %30, %35 : vector<2x128xf32>
    %c4_i32 = arith.constant 4 : i32
    %37 = tpu.dynamic_rotate %36 by %c4_i32 dim 1 : vector<2x128xf32>, i32 -> vector<2x128xf32>
    %c4_i32_15 = arith.constant 4 : i32
    %38 = vector.broadcast %c4_i32_15 : i32 to vector<2x128xi32>
    %39 = arith.cmpi sge, %16, %38 : vector<2x128xi32>
    %cst_16 = arith.constant 0.000000e+00 : f32
    %40 = vector.broadcast %cst_16 : f32 to vector<2x128xf32>
    %41 = arith.select %39, %37, %40 : vector<2x128xi1>, vector<2x128xf32>
    %42 = arith.addf %36, %41 : vector<2x128xf32>
    %c8_i32 = arith.constant 8 : i32
    %43 = tpu.dynamic_rotate %42 by %c8_i32 dim 1 : vector<2x128xf32>, i32 -> vector<2x128xf32>
    %c8_i32_17 = arith.constant 8 : i32
    %44 = vector.broadcast %c8_i32_17 : i32 to vector<2x128xi32>
    %45 = arith.cmpi sge, %16, %44 : vector<2x128xi32>
    %cst_18 = arith.constant 0.000000e+00 : f32
    %46 = vector.broadcast %cst_18 : f32 to vector<2x128xf32>
    %47 = arith.select %45, %43, %46 : vector<2x128xi1>, vector<2x128xf32>
    %48 = arith.addf %42, %47 : vector<2x128xf32>
    %c16_i32 = arith.constant 16 : i32
    %49 = tpu.dynamic_rotate %48 by %c16_i32 dim 1 : vector<2x128xf32>, i32 -> vector<2x128xf32>
    %c16_i32_19 = arith.constant 16 : i32
    %50 = vector.broadcast %c16_i32_19 : i32 to vector<2x128xi32>
    %51 = arith.cmpi sge, %16, %50 : vector<2x128xi32>
    %cst_20 = arith.constant 0.000000e+00 : f32
    %52 = vector.broadcast %cst_20 : f32 to vector<2x128xf32>
    %53 = arith.select %51, %49, %52 : vector<2x128xi1>, vector<2x128xf32>
    %54 = arith.addf %48, %53 : vector<2x128xf32>
    %c32_i32 = arith.constant 32 : i32
    %55 = tpu.dynamic_rotate %54 by %c32_i32 dim 1 : vector<2x128xf32>, i32 -> vector<2x128xf32>
    %c32_i32_21 = arith.constant 32 : i32
    %56 = vector.broadcast %c32_i32_21 : i32 to vector<2x128xi32>
    %57 = arith.cmpi sge, %16, %56 : vector<2x128xi32>
    %cst_22 = arith.constant 0.000000e+00 : f32
    %58 = vector.broadcast %cst_22 : f32 to vector<2x128xf32>
    %59 = arith.select %57, %55, %58 : vector<2x128xi1>, vector<2x128xf32>
    %60 = arith.addf %54, %59 : vector<2x128xf32>
    %c64_i32 = arith.constant 64 : i32
    %61 = tpu.dynamic_rotate %60 by %c64_i32 dim 1 : vector<2x128xf32>, i32 -> vector<2x128xf32>
    %c64_i32_23 = arith.constant 64 : i32
    %62 = vector.broadcast %c64_i32_23 : i32 to vector<2x128xi32>
    %63 = arith.cmpi sge, %16, %62 : vector<2x128xi32>
    %cst_24 = arith.constant 0.000000e+00 : f32
    %64 = vector.broadcast %cst_24 : f32 to vector<2x128xf32>
    %65 = arith.select %63, %61, %64 : vector<2x128xi1>, vector<2x128xf32>
    %66 = arith.addf %60, %65 : vector<2x128xf32>
    %c0_25 = arith.constant 0 : index
    %c0_26 = arith.constant 0 : index
    %c0_27 = arith.constant 0 : index
    %67 = vector.load %arg6[%c0_25, %c0_26, %c0_27] : memref<2x2x1xf32, #tpu.memory_space<vmem>>, vector<1x2x1xf32>
    %68 = vector.shape_cast %67 : vector<1x2x1xf32> to vector<2x1xf32>
    %69 = vector.broadcast %68 : vector<2x1xf32> to vector<2x128xf32>
    %70 = arith.addf %66, %69 : vector<2x128xf32>
    %71 = vector.extract_strided_slice %70 {offsets = [0, 127], sizes = [2, 1], strides = [1, 1]} : vector<2x128xf32> to vector<2x1xf32>
    %c0_28 = arith.constant 0 : index
    %c0_29 = arith.constant 0 : index
    %c0_30 = arith.constant 0 : index
    %72 = vector.load %arg6[%c0_28, %c0_29, %c0_30] : memref<2x2x1xf32, #tpu.memory_space<vmem>>, vector<1x2x1xf32>
    %73 = vector.shape_cast %72 : vector<1x2x1xf32> to vector<2x1xf32>
    %74 = vector.shape_cast %71 : vector<2x1xf32> to vector<1x2x1xf32>
    tpu.vector_store %arg6[%c0_28, %c0_29, %c0_30], %74 {strides = array<i32>} : memref<2x2x1xf32, #tpu.memory_space<vmem>>, vector<1x2x1xf32>,
    %75 = vector.extract_strided_slice %70 {offsets = [0, 0], sizes = [1, 128], strides = [1, 1]} : vector<2x128xf32> to vector<1x128xf32>
    %76 = vector.extract_strided_slice %70 {offsets = [1, 0], sizes = [1, 128], strides = [1, 1]} : vector<2x128xf32> to vector<1x128xf32>
    %77 = arith.mulf %75, %15 : vector<1x128xf32>
    %cst_31 = arith.constant 2.000000e+00 : f32
    %78 = vector.broadcast %cst_31 : f32 to vector<1x128xf32>
    %79 = arith.mulf %78, %77 : vector<1x128xf32>
    %80 = arith.mulf %79, %75 : vector<1x128xf32>
    %81 = arith.subf %76, %80 : vector<1x128xf32>
    %82 = arith.mulf %81, %15 : vector<1x128xf32>
    %83 = arith.mulf %77, %77 : vector<1x128xf32>
    %84 = arith.addf %82, %83 : vector<1x128xf32>
    %cst_32 = arith.constant 9.99999974E-6 : f32
    %85 = vector.broadcast %cst_32 : f32 to vector<1x128xf32>
    %86 = arith.addf %84, %85 : vector<1x128xf32>
    %87 = math.rsqrt %86 : vector<1x128xf32>
    %88 = vector.broadcast %77 : vector<1x128xf32> to vector<4x128xf32>
    %89 = arith.subf %18, %88 : vector<4x128xf32>
    %90 = vector.broadcast %87 : vector<1x128xf32> to vector<4x128xf32>
    %91 = arith.mulf %89, %90 : vector<4x128xf32>
    %92 = vector.broadcast %3 : vector<4x1xf32> to vector<4x128xf32>
    %93 = arith.mulf %91, %92 : vector<4x128xf32>
    %94 = vector.broadcast %4 : vector<4x1xf32> to vector<4x128xf32>
    %95 = arith.addf %93, %94 : vector<4x128xf32>
    %c0_33 = arith.constant 0 : index
    %c0_34 = arith.constant 0 : index
    %c0_35 = arith.constant 0 : index
    %96 = vector.load %arg5[%c0_33, %c0_34, %c0_35] : memref<2x4x128xf32, #tpu.memory_space<vmem>>, vector<1x4x128xf32>
    %97 = vector.shape_cast %96 : vector<1x4x128xf32> to vector<4x128xf32>
    %98 = vector.shape_cast %95 : vector<4x128xf32> to vector<1x4x128xf32>
    tpu.vector_store %arg5[%c0_33, %c0_34, %c0_35], %98 {strides = array<i32>} : memref<2x4x128xf32, #tpu.memory_space<vmem>>, vector<1x4x128xf32>,
    %c1 = arith.constant 1 : index
    %c0_36 = arith.constant 0 : index
    %c0_37 = arith.constant 0 : index
    %99 = vector.load %arg2[%c1, %c0_36, %c0_37] : memref<2x4x128xf32, #tpu.memory_space<vmem>>, vector<1x4x128xf32>
    %100 = vector.shape_cast %99 : vector<1x4x128xf32> to vector<4x128xf32>
    %cst_38 = arith.constant dense<0.000000e+00> : vector<128xf32>
    %101 = vector.multi_reduction <add>, %100, %cst_38 [0] : vector<4x128xf32> to vector<128xf32>
    %102 = vector.shape_cast %101 : vector<128xf32> to vector<1x128xf32>
    %103 = arith.mulf %100, %100 : vector<4x128xf32>
    %cst_39 = arith.constant dense<0.000000e+00> : vector<128xf32>
    %104 = vector.multi_reduction <add>, %103, %cst_39 [0] : vector<4x128xf32> to vector<128xf32>
    %105 = vector.shape_cast %104 : vector<128xf32> to vector<1x128xf32>
    %106 = tpu.concatenate %102, %105 in 0 : vector<1x128xf32>, vector<1x128xf32> -> vector<2x128xf32>
    %c1_i32_40 = arith.constant 1 : i32
    %107 = tpu.dynamic_rotate %106 by %c1_i32_40 dim 1 : vector<2x128xf32>, i32 -> vector<2x128xf32>
    %c1_i32_41 = arith.constant 1 : i32
    %108 = vector.broadcast %c1_i32_41 : i32 to vector<2x128xi32>
    %109 = arith.cmpi sge, %16, %108 : vector<2x128xi32>
    %cst_42 = arith.constant 0.000000e+00 : f32
    %110 = vector.broadcast %cst_42 : f32 to vector<2x128xf32>
    %111 = arith.select %109, %107, %110 : vector<2x128xi1>, vector<2x128xf32>
    %112 = arith.addf %106, %111 : vector<2x128xf32>
    %c2_i32_43 = arith.constant 2 : i32
    %113 = tpu.dynamic_rotate %112 by %c2_i32_43 dim 1 : vector<2x128xf32>, i32 -> vector<2x128xf32>
    %c2_i32_44 = arith.constant 2 : i32
    %114 = vector.broadcast %c2_i32_44 : i32 to vector<2x128xi32>
    %115 = arith.cmpi sge, %16, %114 : vector<2x128xi32>
    %cst_45 = arith.constant 0.000000e+00 : f32
    %116 = vector.broadcast %cst_45 : f32 to vector<2x128xf32>
    %117 = arith.select %115, %113, %116 : vector<2x128xi1>, vector<2x128xf32>
    %118 = arith.addf %112, %117 : vector<2x128xf32>
    %c4_i32_46 = arith.constant 4 : i32
    %119 = tpu.dynamic_rotate %118 by %c4_i32_46 dim 1 : vector<2x128xf32>, i32 -> vector<2x128xf32>
    %c4_i32_47 = arith.constant 4 : i32
    %120 = vector.broadcast %c4_i32_47 : i32 to vector<2x128xi32>
    %121 = arith.cmpi sge, %16, %120 : vector<2x128xi32>
    %cst_48 = arith.constant 0.000000e+00 : f32
    %122 = vector.broadcast %cst_48 : f32 to vector<2x128xf32>
    %123 = arith.select %121, %119, %122 : vector<2x128xi1>, vector<2x128xf32>
    %124 = arith.addf %118, %123 : vector<2x128xf32>
    %c8_i32_49 = arith.constant 8 : i32
    %125 = tpu.dynamic_rotate %124 by %c8_i32_49 dim 1 : vector<2x128xf32>, i32 -> vector<2x128xf32>
    %c8_i32_50 = arith.constant 8 : i32
    %126 = vector.broadcast %c8_i32_50 : i32 to vector<2x128xi32>
    %127 = arith.cmpi sge, %16, %126 : vector<2x128xi32>
    %cst_51 = arith.constant 0.000000e+00 : f32
    %128 = vector.broadcast %cst_51 : f32 to vector<2x128xf32>
    %129 = arith.select %127, %125, %128 : vector<2x128xi1>, vector<2x128xf32>
    %130 = arith.addf %124, %129 : vector<2x128xf32>
    %c16_i32_52 = arith.constant 16 : i32
    %131 = tpu.dynamic_rotate %130 by %c16_i32_52 dim 1 : vector<2x128xf32>, i32 -> vector<2x128xf32>
    %c16_i32_53 = arith.constant 16 : i32
    %132 = vector.broadcast %c16_i32_53 : i32 to vector<2x128xi32>
    %133 = arith.cmpi sge, %16, %132 : vector<2x128xi32>
    %cst_54 = arith.constant 0.000000e+00 : f32
    %134 = vector.broadcast %cst_54 : f32 to vector<2x128xf32>
    %135 = arith.select %133, %131, %134 : vector<2x128xi1>, vector<2x128xf32>
    %136 = arith.addf %130, %135 : vector<2x128xf32>
    %c32_i32_55 = arith.constant 32 : i32
    %137 = tpu.dynamic_rotate %136 by %c32_i32_55 dim 1 : vector<2x128xf32>, i32 -> vector<2x128xf32>
    %c32_i32_56 = arith.constant 32 : i32
    %138 = vector.broadcast %c32_i32_56 : i32 to vector<2x128xi32>
    %139 = arith.cmpi sge, %16, %138 : vector<2x128xi32>
    %cst_57 = arith.constant 0.000000e+00 : f32
    %140 = vector.broadcast %cst_57 : f32 to vector<2x128xf32>
    %141 = arith.select %139, %137, %140 : vector<2x128xi1>, vector<2x128xf32>
    %142 = arith.addf %136, %141 : vector<2x128xf32>
    %c64_i32_58 = arith.constant 64 : i32
    %143 = tpu.dynamic_rotate %142 by %c64_i32_58 dim 1 : vector<2x128xf32>, i32 -> vector<2x128xf32>
    %c64_i32_59 = arith.constant 64 : i32
    %144 = vector.broadcast %c64_i32_59 : i32 to vector<2x128xi32>
    %145 = arith.cmpi sge, %16, %144 : vector<2x128xi32>
    %cst_60 = arith.constant 0.000000e+00 : f32
    %146 = vector.broadcast %cst_60 : f32 to vector<2x128xf32>
    %147 = arith.select %145, %143, %146 : vector<2x128xi1>, vector<2x128xf32>
    %148 = arith.addf %142, %147 : vector<2x128xf32>
    %c1_61 = arith.constant 1 : index
    %c0_62 = arith.constant 0 : index
    %c0_63 = arith.constant 0 : index
    %149 = vector.load %arg6[%c1_61, %c0_62, %c0_63] : memref<2x2x1xf32, #tpu.memory_space<vmem>>, vector<1x2x1xf32>
    %150 = vector.shape_cast %149 : vector<1x2x1xf32> to vector<2x1xf32>
    %151 = vector.broadcast %150 : vector<2x1xf32> to vector<2x128xf32>
    %152 = arith.addf %148, %151 : vector<2x128xf32>
    %153 = vector.extract_strided_slice %152 {offsets = [0, 127], sizes = [2, 1], strides = [1, 1]} : vector<2x128xf32> to vector<2x1xf32>
    %c1_64 = arith.constant 1 : index
    %c0_65 = arith.constant 0 : index
    %c0_66 = arith.constant 0 : index
    %154 = vector.load %arg6[%c1_64, %c0_65, %c0_66] : memref<2x2x1xf32, #tpu.memory_space<vmem>>, vector<1x2x1xf32>
    %155 = vector.shape_cast %154 : vector<1x2x1xf32> to vector<2x1xf32>
    %156 = vector.shape_cast %153 : vector<2x1xf32> to vector<1x2x1xf32>
    tpu.vector_store %arg6[%c1_64, %c0_65, %c0_66], %156 {strides = array<i32>} : memref<2x2x1xf32, #tpu.memory_space<vmem>>, vector<1x2x1xf32>,
    %157 = vector.extract_strided_slice %152 {offsets = [0, 0], sizes = [1, 128], strides = [1, 1]} : vector<2x128xf32> to vector<1x128xf32>
    %158 = vector.extract_strided_slice %152 {offsets = [1, 0], sizes = [1, 128], strides = [1, 1]} : vector<2x128xf32> to vector<1x128xf32>
    %159 = arith.mulf %157, %15 : vector<1x128xf32>
    %cst_67 = arith.constant 2.000000e+00 : f32
    %160 = vector.broadcast %cst_67 : f32 to vector<1x128xf32>
    %161 = arith.mulf %160, %159 : vector<1x128xf32>
    %162 = arith.mulf %161, %157 : vector<1x128xf32>
    %163 = arith.subf %158, %162 : vector<1x128xf32>
    %164 = arith.mulf %163, %15 : vector<1x128xf32>
    %165 = arith.mulf %159, %159 : vector<1x128xf32>
    %166 = arith.addf %164, %165 : vector<1x128xf32>
    %cst_68 = arith.constant 9.99999974E-6 : f32
    %167 = vector.broadcast %cst_68 : f32 to vector<1x128xf32>
    %168 = arith.addf %166, %167 : vector<1x128xf32>
    %169 = math.rsqrt %168 : vector<1x128xf32>
    %170 = vector.broadcast %159 : vector<1x128xf32> to vector<4x128xf32>
    %171 = arith.subf %100, %170 : vector<4x128xf32>
    %172 = vector.broadcast %169 : vector<1x128xf32> to vector<4x128xf32>
    %173 = arith.mulf %171, %172 : vector<4x128xf32>
    %174 = vector.broadcast %3 : vector<4x1xf32> to vector<4x128xf32>
    %175 = arith.mulf %173, %174 : vector<4x128xf32>
    %176 = vector.broadcast %4 : vector<4x1xf32> to vector<4x128xf32>
    %177 = arith.addf %175, %176 : vector<4x128xf32>
    %c1_69 = arith.constant 1 : index
    %c0_70 = arith.constant 0 : index
    %c0_71 = arith.constant 0 : index
    %178 = vector.load %arg5[%c1_69, %c0_70, %c0_71] : memref<2x4x128xf32, #tpu.memory_space<vmem>>, vector<1x4x128xf32>
    %179 = vector.shape_cast %178 : vector<1x4x128xf32> to vector<4x128xf32>
    %180 = vector.shape_cast %177 : vector<4x128xf32> to vector<1x4x128xf32>
    tpu.vector_store %arg5[%c1_69, %c0_70, %c0_71], %180 {strides = array<i32>} : memref<2x4x128xf32, #tpu.memory_space<vmem>>, vector<1x4x128xf32>,
    return
  }
  func.func @transform_0(%arg0: i32, %arg1: i32) -> (i32, i32, i32) {
    %c0_i32 = arith.constant 0 : i32
    %c0_i32_0 = arith.constant 0 : i32
    return %arg0, %c0_i32, %arg1 : i32, i32, i32
  }
  func.func @transform_1(%arg0: i32, %arg1: i32) -> (i32, i32) {
    %c0_i32 = arith.constant 0 : i32
    %c0_i32_0 = arith.constant 0 : i32
    %c0_i32_1 = arith.constant 0 : i32
    return %c0_i32, %c0_i32_0 : i32, i32
  }
  func.func @transform_2(%arg0: i32, %arg1: i32) -> (i32, i32) {
    %c0_i32 = arith.constant 0 : i32
    %c0_i32_0 = arith.constant 0 : i32
    %c0_i32_1 = arith.constant 0 : i32
    return %c0_i32, %c0_i32_0 : i32, i32
  }
  func.func @transform_3(%arg0: i32, %arg1: i32) -> (i32, i32, i32) {
    %c0_i32 = arith.constant 0 : i32
    %c0_i32_0 = arith.constant 0 : i32
    return %arg0, %c0_i32, %arg1 : i32, i32, i32
  }
}

</mosaic_0001>

<bundles_post_ra>
// kernel: tpu_custom_call.1
= control target key start
LH: loop header
LB: loop body
LE: loop exit
PB: predicated region body
PF: predicated region fallthrough
CT: control target
= control target key end

     0   :  { %8 = vsyncpa [#allocation4], 0  ;;  %s1021_s0 = inlined_call_operand.hbm [shape: f32[4,4,384], index: 0, kind: input, shape index: {}]   ;;  %s1022_s1 = inlined_call_operand.vmem [shape: f32[4,1], index: 1, kind: input, shape index: {}]   ;;  %s1023_s2 = inlined_call_operand.vmem [shape: f32[4,1], index: 2, kind: input, shape index: {}]   ;;  %s1024_s3 = inlined_call_operand.hbm [shape: f32[4,4,384], index: 3, kind: output, shape index: {}]  }
   0x1   :  { %10 = vsyncpa [#allocation4 + $0x1], 0 }
   0x2   :  { %11 = vsyncpa [#allocation5], 0 }
   0x3   :  { %13 = vsyncpa [#allocation5 + $0x1], 0  ;;  %s808_s12 = smov 0   ;;  %s810_s13 = smov 0  }
   0x4   :  { %s812_s14 = smov 0   ;;  %s814_s15 = smov 0  }
   0x5   :  { %s816_s16 = smov 0   ;;  %s818_s17 = smov 0  }
   0x6   :  { %s820_s18 = smov 0   ;;  %s822_s19 = smov 0  }
   0x7 LB: > { %s525_s20 = sadd.s32 4294967295, %s771_s19   ;;  %s526_s21 = sadd.s32 4294967294, %s771_s19   ;;  %s771_s19 = sphi %s822_s19, %s19_s19   ;;  %s767_s18 = sphi %s820_s18, %s1039_s18   ;;  %s763_s17 = sphi %s818_s17, %s1038_s17   ;;  %s759_s16 = sphi %s816_s16, %s1037_s16   ;;  %s755_s15 = sphi %s814_s15, %s1036_s15   ;;  %s751_s14 = sphi %s812_s14, %s1035_s14   ;;  %s747_s13 = sphi %s810_s13, %s1034_s13   ;;  %s743_s12 = sphi %s808_s12, %s1033_s12  }
   0x8   : > { %s28_s22 = sadd.s32 1, %s763_s17  ;;  %s31_s23 = sadd.s32 1, %s767_s18 }
   0x9   : > { %p29_p0 = scmp.ge.s32.totalorder %s28_s22, 3  ;;  %s40_s24 = sadd.s32 1, %s751_s14 }
   0xa   : > { %p47_p1 = scmp.ne.s32.totalorder %s751_s14, %s747_s13  ;;  %p48_p2 = scmp.eq.s32.totalorder %s771_s19, 0 }
   0xb   : > { %s1041_s22 = smov (%p29_p0, %s28_s22), 0  ;;  %s1043_s23 = smov (!%p29_p0, %s31_s23), %s767_s18 }
   0xc   : > { %s36_s25 = ssub.s32 %s763_s17, %s1041_s22  ;;  %p861_p3 = por %p48_p2, %p47_p1 }
   0xd   : > { %p33_p4 = scmp.ge.s32.totalorder %s1043_s23, 2  ;;  %p53_p5 = scmp.ne.s32.totalorder %s747_s13, %s743_s12 }
   0xe   : > { %p54_p6 = scmp.eq.s32.totalorder %s525_s20, 0  ;;  %p121_p7 = scmp.eq.s32.totalorder %s525_s20, 5 }
   0xf   : > { %s1045_s23 = smov (%p33_p4, %s1043_s23), 0  ;;  %p127_p10 = scmp.eq.s32.totalorder %s526_s21, 5 }
  0x10   : > { %1027 = sst [smem:[#allocation9_spill]] %s1045_s23  ;;  %p869_p8 = por %p54_p6, %p53_p5 }
  0x11   : > { %p873_p9 = por %p121_p7, %p47_p1  ;;  %s35_s29 = ssub.s32 %s767_s18, %s1045_s23 }
  0x12   : > { %s37_s30 = sor.u32 %s36_s25, %s35_s29  ;;  %p879_p12 = por %p127_p10, %p53_p5 }
  0x13   : > { %p38_p11 = scmp.eq.s32.totalorder %s37_s30, 0  ;;  %p560_p13 = scmp.lt.s32.totalorder %s771_s19, 6 }
  0x14   : > { %s153_s5 = sand.u32 1, %s751_s14   ;;  %s546_s8 = smul.u32 6, %s767_s18 }
  0x15   : > { %s886_s6 = scalar_select %p38_p11, %s751_s14, %s40_s24  }
  0x16   : > { %s529_s7 = sshll.u32 %s153_s5, 3  ;;  %p891_p0 = pnand %p560_p13, %p861_p3 }
  0x17   : > { %s157_s9 = scalar_lea.vmem [#allocation3], %s529_s7  ;;  %s163_s20 = sadd.s32 %s763_s17, %s546_s8 }
  0x18   : > { %s166_s10 = sshll.u32 %s157_s9, 4  ;;  %s532_s21 = sshll.u32 %s163_s20, 6  ;;  %s167_s10 = int_to_ptr.vmem [resolvable:$true] %s166_s10 }
  0x19   : > { %s165_s30 = scalar_lea.hbm %s1021_s0, %s532_s21  ;;  %s154_s23 = scalar_lea.sflag [#allocation4], %s153_s5 }
  0x1a   : > { %p649_p1 = pneg %p891_p0  ;;  %s660_s24 = scalar_lea.vmem %s167_s10, 128 }
  0x1b   : > { %p661_p2 = scmp.ne.s32.totalorder %s167_s10, %s660_s24  ;;  %s773_s26 = smov [#allocation3]  }
  0x1c   : > { %s665_s7 = sshll.u32 %s773_s26, 4  ;;  %s666_s7 = int_to_ptr.vmem [resolvable:$false] %s665_s7 }
  0x1d   : > { %p663_p4 = pnand %p661_p2, %p649_p1  ;;  %s667_s9 = scalar_lea.vmem %s666_s7, 256 }
  0x1e   : > { %p668_p3 = scmp.lt.s32.totalorder %s167_s10, %s666_s7  ;;  %p669_p6 = scmp.lt.s32.totalorder %s667_s9, %s660_s24 }
  0x1f   : > { %p664_p5 = pneg %p663_p4 }
  0x20   : > { %p670_p7 = por %p669_p6, %p668_p3 }
  0x22   : > { %p671_p10 = pnand %p670_p7, %p664_p5 }
  0x24   : > { %674 = shalt.err (!%p671_p10)
}
  0x25   : > { %s774_s8 = smov 192   ;;  %s775_s5 = smov 64  }
  0x26   : > { %s776_s20 = smov 4   ;;  %p533_p11 = scmp.ge.s32.totalorder %s771_s19, 1 }
  0x27   : > { %555 = dma.hbm_to_vmem [thread:$0]  (!%p891_p0), %s165_s30, 128, %s167_s10, %s154_s23, %s774_s8, %s775_s5, %s776_s20  }
  0x28   : > { %p174_p13 = scmp.lt.s32.totalorder %s771_s19, 7 }
  0x2a   : > { %p175_p1 = pnand %p533_p11, %p174_p13 }
  0x2b   : > { %s906_s21 = sand.u32 (!%p175_p1), 1, %s747_s13  }
  0x2c   : > { %178 = sbr.rel (%p175_p1) target bundleno = 1024 (0x400), region = 32  ;;  %s534_s25 = sshll.u32 (!%p175_p1), %s906_s21, 3 }
  0x2d   : > { %s181_s29 = scalar_lea.sflag (!%p175_p1), [#allocation4], %s906_s21  ;;  %s184_s24 = scalar_lea.vmem (!%p175_p1), [#allocation3], %s534_s25 }
  0x31   : > { %734 = dma.done.wait (%p869_p8), %s181_s29, 128  }
  0x32   : > { %736 = vsyncadd (%p869_p8), %s181_s29, 4294967168  ;;  %s914_s11 = scalar_lea.vmem [#allocation6], %s534_s25  ;;  %p536_p0 = scmp.ne.s32.totalorder %s755_s15, 0 }
  0x34   : > { %212 = sbr.rel (%p536_p0) target bundleno = 59 (0x3b), region = 40 }
  0x39   : > { %vm213_vm0 = vcmask 1024   ;;  %v777_v0 = vmov 0.0  }
  0x3a   : > { %214 = vst.msk [vmem:[#allocation2] sm:$0x3] %vm213_vm0, %v777_v0  ;;  %215 = vst.msk [vmem:[#allocation2 + $0x2] sm:$0x3] %vm213_vm0, %v777_v0 }
  0x3b PF: > { %v917_v1 = vld [vmem:[%s184_s24] sm:$0xf]  ;;  %vm229_vm1 = vcmask 1043456   ;;  %v922_v4 = vld [vmem:[%s184_s24 + $0x4] sm:$0xf]  ;;  %vm245_vm2 = vcmask 1040384   ;;  %v218_v35 = vlaneseq }
  0x3c   : > { %v230_v2 = vsel %vm229_vm1, %v917_v1, 0.0  ;;  %v237_v3 = vmul.f32 %v917_v1, %v917_v1  ;;  %v335_v6 = vsel %vm229_vm1, %v922_v4, 0.0  ;;  %v342_v7 = vmul.f32 %v922_v4, %v922_v4  ;;  %s778_s23 = smov 1   ;;  %s779_s27 = smov 2  }
  0x3d   : > { %v231_v5 = vrot.slane %v230_v2, 4  ;;  %v336_v9 = vrot.slane %v335_v6, 4  ;;  %v930_v36 = vand.u32 127, %v218_v35  ;;  %s780_s10 = smov 4   ;;  %s781_s30 = smov 8   ;;  %v782_v55 = vmov 0  }
  0x3e   : > { %v238_v8 = vsel %vm229_vm1, %v237_v3, 0.0  ;;  %v343_v12 = vsel %vm229_vm1, %v342_v7, 0.0  ;;  %640 = vset.pattern.permute.xlu1 %v782_v55  ;;  %639 = vset.pattern.permute.xlu0 %v782_v55  ;;  %s783_s26 = smov 16   ;;  %s784_s7 = smov 32  }
  0x3f   : > { %v232_v10 = vadd.f32 %v231_v5, %v230_v2  ;;  %v239_v11 = vrot.slane %v238_v8, 4  ;;  %v337_v13 = vadd.f32 %v336_v9, %v335_v6  ;;  %v344_v14 = vrot.slane %v343_v12, 4  ;;  %s785_s9 = smov 64   ;;  %s537_s29 = sshll.u32 %s755_s15, 7 }
  0x40   : > { %vm249_vm3 = vcmp.ge.s32.totalorder %v930_v36, 1  ;;  %vm254_vm4 = vcmp.ge.s32.totalorder %v930_v36, 2  ;;  %vm259_vm5 = vcmp.ge.s32.totalorder %v930_v36, 4  ;;  %vm264_vm6 = vcmp.ge.s32.totalorder %v930_v36, 8  ;;  %s547_s24 = smul.u32 6, %s759_s16  ;;  %s786_s5 = smov [#allocation6]  }
  0x41   : > { %v233_v15 = vrot.slane %v232_v10, 2  ;;  %v240_v16 = vadd.f32 %v239_v11, %v238_v8  ;;  %v338_v17 = vrot.slane %v337_v13, 2  ;;  %v345_v18 = vadd.f32 %v344_v14, %v343_v12  ;;  %v282_v5 = vld [vmem:[#allocation2] sm:$0x3]  ;;  %v380_v7 = vld [vmem:[#allocation2 + $0x2] sm:$0x3] }
  0x42   : > { %vm269_vm7 = vcmp.ge.s32.totalorder %v930_v36, 16  ;;  %vm274_vm8 = vcmp.ge.s32.totalorder %v930_v36, 32  ;;  %vm279_vm9 = vcmp.ge.s32.totalorder %v930_v36, 64  ;;  %s679_s20 = sshll.u32 %s786_s5, 4  ;;  %s680_s20 = int_to_ptr.vmem [resolvable:$false] %s679_s20 }
  0x43   : > { %v234_v19 = vadd.f32 %v233_v15, %v232_v10  ;;  %v241_v20 = vrot.slane %v240_v16, 2  ;;  %v339_v21 = vadd.f32 %v338_v17, %v337_v13  ;;  %v346_v22 = vrot.slane %v345_v18, 2  ;;  %v216_v13 = vld [vmem:[%s1022_s1] sm:$0xf]  ;;  %s681_s25 = scalar_lea.vmem %s680_s20, 256 }
  0x44   : > { %v217_v15 = vld [vmem:[%s1023_s2] sm:$0xf] }
  0x45   : > { %v235_v23 = vrot.slane %v234_v19, 1  ;;  %v242_v24 = vadd.f32 %v241_v20, %v240_v16  ;;  %v340_v25 = vrot.slane %v339_v21, 1  ;;  %v347_v26 = vadd.f32 %v346_v22, %v345_v18 }
  0x46   : > { %v221_v16 = vstv %s537_s29 }
  0x47   : > { %v236_v27 = vadd.f32 %v235_v23, %v234_v19  ;;  %v243_v28 = vrot.slane %v242_v24, 1  ;;  %v348_v29 = vrot.slane %v347_v26, 1  ;;  %v341_v31 = vadd.f32 %v340_v25, %v339_v21 }
  0x48   : > { %v222_v17 = vadd.s32 %v221_v16, %v930_v36 }
  0x49   : > { %v244_v30 = vadd.f32 %v243_v28, %v242_v24  ;;  %v349_v32 = vadd.f32 %v348_v29, %v347_v26 }
  0x4a   : > { %v223_v18 = vadd.s32 1, %v222_v17 }
  0x4b   : > { %v246_v33 = vsel %vm245_vm2, %v236_v27, %v244_v30  ;;  %v350_v34 = vsel %vm245_vm2, %v341_v31, %v349_v32 }
  0x4c   : > { %247 = vrot.lane.b32.xlu0 %v246_v33, %s778_s23  ;;  %v224_v19 = vcvt.s32.f32 %v223_v18 }
  0x4e   : > { %v225_v20 = vmul.f32 4.0, %v224_v19 }
  0x50   : > { %351 = vrot.lane.b32.xlu0 %v350_v34, %s778_s23  ;;  %641 = vrcp.f32 %v225_v20 }
  0x5d   : > { %v642_v26 = vpop.eup %641 }
  0xbe   : > { %v248_v37 = vpop.permute.xlu0 %247 }
  0xbf   : > { %v250_v38 = vsel %vm249_vm3, %v248_v37, 0.0 }
  0xc0   : > { %v251_v39 = vadd.f32 %v250_v38, %v246_v33 }
  0xc2   : > { %v352_v40 = vpop.permute.xlu0 %351  ;;  %252 = vrot.lane.b32.xlu1 %v251_v39, %s779_s27 }
  0xc3   : > { %v353_v41 = vsel %vm249_vm3, %v352_v40, 0.0 }
  0xc4   : > { %v354_v42 = vadd.f32 %v353_v41, %v350_v34 }
  0xc6   : > { %355 = vrot.lane.b32.xlu1 %v354_v42, %s779_s27  ;;  %s437_s27 = sshll.u32 %s914_s11, 4  ;;  %s965_s27 = int_to_ptr.vmem [resolvable:$true] %s437_s27 }
  0xc7   : > { %s675_s8 = scalar_lea.vmem %s965_s27, 128  ;;  %p682_p5 = scmp.lt.s32.totalorder %s965_s27, %s680_s20 }
  0xc8   : > { %p676_p8 = scmp.ne.s32.totalorder %s965_s27, %s675_s8  ;;  %p683_p3 = scmp.lt.s32.totalorder %s681_s25, %s675_s8 }
  0xca   : > { %p677_p2 = pnand %p676_p8, %p873_p9  ;;  %p684_p6 = por %p683_p3, %p682_p5 }
  0xcc   : > { %p678_p4 = pneg %p677_p2 }
  0xce   : > { %p685_p7 = pnand %p684_p6, %p678_p4 }
 0x134   : > { %v253_v43 = vpop.permute.xlu1 %252 }
 0x135   : > { %v255_v44 = vsel %vm254_vm4, %v253_v43, 0.0 }
 0x136   : > { %v256_v45 = vadd.f32 %v255_v44, %v251_v39 }
 0x138   : > { %257 = vrot.lane.b32.xlu0 %v256_v45, %s780_s10  ;;  %v356_v46 = vpop.permute.xlu1 %355 }
 0x139   : > { %v357_v47 = vsel %vm254_vm4, %v356_v46, 0.0 }
 0x13a   : > { %v358_v48 = vadd.f32 %v357_v47, %v354_v42 }
 0x13c   : > { %359 = vrot.lane.b32.xlu1 %v358_v48, %s780_s10 }
 0x1aa   : > { %v258_v49 = vpop.permute.xlu0 %257 }
 0x1ab   : > { %v260_v50 = vsel %vm259_vm5, %v258_v49, 0.0 }
 0x1ac   : > { %v261_v51 = vadd.f32 %v260_v50, %v256_v45 }
 0x1ae   : > { %262 = vrot.lane.b32.xlu0 %v261_v51, %s781_s30  ;;  %v360_v52 = vpop.permute.xlu1 %359 }
 0x1af   : > { %v361_v53 = vsel %vm259_vm5, %v360_v52, 0.0 }
 0x1b0   : > { %v362_v54 = vadd.f32 %v361_v53, %v358_v48  ;;  %v311_v53 = vshrl.u32 %v218_v35, 7 }
 0x1b2   : > { %363 = vrot.lane.b32.xlu1 %v362_v54, %s781_s30 }
 0x220   : > { %v263_v56 = vpop.permute.xlu0 %262 }
 0x221   : > { %v265_v57 = vsel %vm264_vm6, %v263_v56, 0.0  ;;  %v317_v56 = vsub.s32 1, %v311_v53 }
 0x222   : > { %v266_v58 = vadd.f32 %v265_v57, %v261_v51 }
 0x224   : > { %267 = vrot.lane.b32.xlu0 %v266_v58, %s783_s26  ;;  %v364_v59 = vpop.permute.xlu1 %363 }
 0x225   : > { %v365_v60 = vsel %vm264_vm6, %v364_v59, 0.0 }
 0x226   : > { %v366_v61 = vadd.f32 %v365_v60, %v362_v54  ;;  %v312_v54 = vsub.s32 0, %v311_v53 }
 0x228   : > { %367 = vrot.lane.b32.xlu1 %v366_v61, %s783_s26 }
 0x296   : > { %v268_v62 = vpop.permute.xlu0 %267 }
 0x297   : > { %v270_v63 = vsel %vm269_vm7, %v268_v62, 0.0 }
 0x298   : > { %v271_v0 = vadd.f32 %v270_v63, %v266_v58 }
 0x29a   : > { %272 = vrot.lane.b32.xlu0 %v271_v0, %s784_s7  ;;  %v368_v2 = vpop.permute.xlu1 %367 }
 0x29b   : > { %v369_v3 = vsel %vm269_vm7, %v368_v2, 0.0 }
 0x29c   : > { %v370_v6 = vadd.f32 %v369_v3, %v366_v61 }
 0x29e   : > { %371 = vrot.lane.b32.xlu1 %v370_v6, %s784_s7  ;;  %285 = vperm.xlu0 %639, %v282_v5  }
 0x2a2   : > { %383 = vperm.xlu1 %640, %v380_v7  }
 0x30c   : > { %v273_v8 = vpop.permute.xlu0 %272 }
 0x30d   : > { %v275_v9 = vsel %vm274_vm8, %v273_v8, 0.0 }
 0x30e   : > { %v276_v10 = vadd.f32 %v275_v9, %v271_v0 }
 0x310   : > { %277 = vrot.lane.b32.xlu1 %v276_v10, %s785_s9  ;;  %v372_v11 = vpop.permute.xlu1 %371 }
 0x311   : > { %v373_v12 = vsel %vm274_vm8, %v372_v11, 0.0 }
 0x312   : > { %v374_v14 = vadd.f32 %v373_v12, %v370_v6 }
 0x314   : > { %375 = vrot.lane.b32.xlu0 %v374_v14, %s785_s9  ;;  %322 = vperm.xlu1 %640, %v216_v13  }
 0x318   : > { %328 = vperm.xlu0 %639, %v217_v15  }
 0x319   : > { %v286_v22 = vpop.permute.xlu0 %285 }
 0x31d   : > { %v384_v21 = vpop.permute.xlu1 %383 }
 0x382   : > { %v278_v23 = vpop.permute.xlu1 %277 }
 0x383   : > { %v280_v24 = vsel %vm279_vm9, %v278_v23, 0.0 }
 0x384   : > { %v281_v25 = vadd.f32 %v280_v24, %v276_v10 }
 0x386   : > { %v288_v27 = vadd.f32 %v286_v22, %v281_v25  ;;  %v376_v28 = vpop.permute.xlu0 %375 }
 0x387   : > { %v377_v29 = vsel %vm279_vm9, %v376_v28, 0.0 }
 0x388   : > { %v295_v30 = vmul.f32 %v642_v26, %v288_v27  ;;  %v378_v31 = vadd.f32 %v377_v29, %v374_v14  ;;  %290 = vrot.lane.b32.xlu1 %v288_v27, %s778_s23 }
 0x38a   : > { %v296_v32 = vmul.f32 2.0, %v295_v30  ;;  %v386_v33 = vadd.f32 %v384_v21, %v378_v31  ;;  %v303_v39 = vmul.f32 %v295_v30, %v295_v30  ;;  %v313_v55 = vrot.slane %v295_v30, %v312_v54 }
 0x38c   : > { %v297_v34 = vmul.f32 %v296_v32, %v288_v27  ;;  %v392_v37 = vmul.f32 %v642_v26, %v386_v33  ;;  %388 = vrot.lane.b32.xlu0 %v386_v33, %s778_s23  ;;  %v305_v43 = vrot.slane %v303_v39, 7  ;;  %v314_v58 = vsub.f32 %v917_v1, %v313_v55  ;;  %s434_s23 = sadd.s32 %s755_s15, %s547_s24  ;;  %s422_s15 = scalar_lea.sflag [#allocation5], %s906_s21 }
 0x38d   : > { %s543_s16 = sshll.u32 %s434_s23, 6 }
 0x38e   : > { %v299_v38 = vrot.slane %v297_v34, 7  ;;  %v393_v36 = vmul.f32 2.0, %v392_v37  ;;  %v400_v45 = vmul.f32 %v392_v37, %v392_v37  ;;  %v410_v60 = vrot.slane %v392_v37, %v312_v54  ;;  %s963_s7 = scalar_lea.hbm %s1024_s3, %s543_s16 }
 0x38f   : > { %v323_v63 = vpop.permute.xlu1 %322 }
 0x390   : > { %v301_v40 = vsub.f32 %v288_v27, %v299_v38  ;;  %v394_v41 = vmul.f32 %v393_v36, %v386_v33  ;;  %v402_v50 = vrot.slane %v400_v45, 7  ;;  %v411_v35 = vsub.f32 %v922_v4, %v410_v60 }
 0x392   : > { %v302_v42 = vmul.f32 %v642_v26, %v301_v40  ;;  %v396_v44 = vrot.slane %v394_v41, 7 }
 0x393   : > { %v329_v3 = vpop.permute.xlu0 %328 }
 0x394   : > { %v307_v46 = vadd.f32 %v305_v43, %v302_v42  ;;  %v398_v47 = vsub.f32 %v386_v33, %v396_v44 }
 0x396   : > { %v308_v48 = vadd.f32 1e-05, %v307_v46  ;;  %v399_v49 = vmul.f32 %v642_v26, %v398_v47 }
 0x398   : > { %643 = vrsqrt.f32 %v308_v48  ;;  %v404_v51 = vadd.f32 %v402_v50, %v399_v49 }
 0x39a   : > { %v405_v52 = vadd.f32 1e-05, %v404_v51 }
 0x39c   : > { %645 = vrsqrt.f32 %v405_v52 }
 0x3a5   : > { %v644_v57 = vpop.eup %643 }
 0x3a6   : > { %v318_v59 = vrot.slane %v644_v57, %v317_v56 }
 0x3a8   : > { %v319_v61 = vmul.f32 %v318_v59, %v314_v58 }
 0x3a9   : > { %v646_v62 = vpop.eup %645 }
 0x3aa   : > { %v415_v0 = vrot.slane %v646_v62, %v317_v56  ;;  %v325_v2 = vmul.f32 %v323_v63, %v319_v61 }
 0x3ac   : > { %v416_v5 = vmul.f32 %v415_v0, %v411_v35  ;;  %v331_v6 = vadd.f32 %v329_v3, %v325_v2 }
 0x3ae   : > { %v417_v1 = vmul.f32 %v416_v5, %v323_v63  ;;  %332 = vst [vmem:[%s914_s11] sm:$0xf] %v331_v6 }
 0x3b0   : > { %v418_v7 = vadd.f32 %v417_v1, %v329_v3 }
 0x3b2   : > { %539 = vst [vmem:[%s914_s11 + $0x4] sm:$0xf] %v418_v7 }
 0x3b3   : > { %688 = shalt.err (!%p685_p7)
}
 0x3b4   : > { %s689_s11 = scalar_lea.hbm %s963_s7, 128  ;;  %s693_s23 = scalar_lea.hbm %s1024_s3, 768 }
 0x3b5   : > { %p690_p10 = scmp.ne.s32.totalorder %s963_s7, %s689_s11  ;;  %p694_p1 = scmp.lt.s32.totalorder %s963_s7, %s1024_s3 }
 0x3b6   : > { %p695_p0 = scmp.lt.s32.totalorder %s693_s23, %s689_s11 }
 0x3b7   : > { %p691_p11 = pnand %p690_p10, %p873_p9 }
 0x3b8   : > { %p696_p8 = por %p695_p0, %p694_p1 }
 0x3b9   : > { %p692_p13 = pneg %p691_p11 }
 0x3bb   : > { %p697_p2 = pnand %p696_p8, %p692_p13 }
 0x3bd   : > { %700 = shalt.err (!%p697_p2)
}
 0x3be   : > { %s787_s26 = smov 192   ;;  %vm293_vm10 = vcmask 1024  }
 0x3bf   : > { %550 = dma.vmem_to_hbm [thread:$0]  (%p873_p9), %s965_s27, 128, %s963_s7, %s422_s15, %s785_s9, %s787_s26, %s780_s10  }
 0x3fa   : > { %v291_v4 = vpop.permute.xlu1 %290 }
 0x3fb   : > { %294 = vst.msk [vmem:[#allocation2] sm:$0x3] %vm293_vm10, %v291_v4 }
 0x3fe   : > { %v389_v8 = vpop.permute.xlu0 %388 }
 0x3ff   : > { %391 = vst.msk [vmem:[#allocation2 + $0x2] sm:$0x3] %vm293_vm10, %v389_v8 }
 0x400 PF: > { %p561_p4 = scmp.ge.s32.totalorder %s771_s19, 2  ;;  %s452_s8 = sand.u32 1, %s743_s12  }
 0x401   : > { %s453_s28 = scalar_lea.sflag [#allocation5], %s452_s8 }
 0x402   : > { %p557_p5 = pnand %p561_p4, %p879_p12 }
 0x404   : > { %p558_p3 = pneg %p557_p5 }
 0x406   : > { %738 = dma.done.wait (%p558_p3), %s453_s28, 128  }
 0x407   : > { %740 = vsyncadd (%p558_p3), %s453_s28, 4294967168  ;;  %s19_s19 = sadd.s32 1, %s771_s19   ;;  %s1032_s21 = sld [smem:[#allocation9_spill]] }
 0x408   : > { %p16_p9 = scmp.ge.s32.totalorder %s19_s19, 8   ;;  %s1033_s12 = smov %s747_s13 }
 0x409   : > { %s1034_s13 = smov %s751_s14  ;;  %s1035_s14 = smov %s886_s6 }
 0x40a   : > { %s1036_s15 = smov %s763_s17  ;;  %s1037_s16 = smov %s767_s18 }
 0x40b   : > { %s1038_s17 = smov %s1041_s22  ;;  %18 = sbr.rel (!%p16_p9) target bundleno = 7 (0x7), region = 84 }
 0x40d   : > { %s1039_s18 = smov %s1032_s21 }
 0x410   :  { %458 = vsyncpa [#allocation4], 1 }
 0x411   :  { %460 = vsyncpa [#allocation4 + $0x1], 1 }
 0x412   :  { %461 = vsyncpa [#allocation5], 1 }
 0x413   :  { %463 = vsyncpa [#allocation5 + $0x1], 1 }

</bundles_post_ra>
